<compile_context>
chip_gen: v7x
topology: tpu7x:2x2x1
jax: 0.10.0
libtpu: 0.0.40
codegen_flags: <defaults>
</compile_context>

<pallas_src>
import jax
import jax.numpy as jnp
from jax.experimental import pallas as pl
from jax.experimental.pallas import tpu as pltpu


def outconv_kernel(x_ref, w_ref, b_ref, o_ref):
    # x_ref: (C_in, TL), w_ref: (C_out, C_in), b_ref: (C_out, 1), o_ref: (C_out, TL)
    y = jnp.dot(w_ref[...], x_ref[...], preferred_element_type=jnp.float32)
    y = y + b_ref[...]
    o_ref[...] = y.astype(o_ref.dtype)


def out_conv(x, weight, bias, *, tl=1024):
    """x: (N, C_in, L), weight: (C_out, C_in), bias: (C_out,) -> (N, C_out, L)."""
    N, C_in, L = x.shape
    C_out = weight.shape[0]

    # Lane-dense padding: make L a multiple of 128, then a multiple of the
    # chosen tile TL so every grid step gets a full, unmasked block.
    L_lane = pl.cdiv(L, 128) * 128
    tl = min(tl, L_lane)
    L_pad = pl.cdiv(L_lane, tl) * tl
    if L_pad != L:
        x = jnp.pad(x, ((0, 0), (0, 0), (0, L_pad - L)))

    bias2d = bias.reshape(C_out, 1)
    num_l_tiles = L_pad // tl

    cost = pl.CostEstimate(
        flops=2 * N * C_out * C_in * L_pad,
        transcendentals=0,
        bytes_accessed=4 * (N * C_in * L_pad + N * C_out * L_pad
                            + C_out * C_in + C_out),
    )

    out = pl.pallas_call(
        outconv_kernel,
        out_shape=jax.ShapeDtypeStruct((N, C_out, L_pad), x.dtype),
        grid_spec=pltpu.PrefetchScalarGridSpec(
            num_scalar_prefetch=0,
            grid=(N, num_l_tiles),
            in_specs=[
                # batch dim squeezed -> kernel ref is (C_in, tl)
                pl.BlockSpec((None, C_in, tl), lambda n, l: (n, 0, l)),
                # weight / bias: constant index_map -> fetched once, VMEM-resident
                pl.BlockSpec((C_out, C_in), lambda n, l: (0, 0)),
                pl.BlockSpec((C_out, 1), lambda n, l: (0, 0)),
            ],
            out_specs=pl.BlockSpec((None, C_out, tl), lambda n, l: (n, 0, l)),
        ),
        compiler_params=pltpu.CompilerParams(
            dimension_semantics=("parallel", "parallel"),
        ),
        cost_estimate=cost,
    )(x, weight, bias2d)

    if L_pad != L:
        out = out[:, :, :L]
    return out


def init_params(key, in_channels, out_channels):
    # Mimic PyTorch Conv1d default init: uniform(-bound, bound),
    # bound = 1/sqrt(fan_in), fan_in = in_channels * kernel_size = in_channels.
    kw, kb = jax.random.split(key)
    bound = 1.0 / jnp.sqrt(jnp.float32(in_channels))
    weight = jax.random.uniform(
        kw, (out_channels, in_channels), jnp.float32, -bound, bound)
    bias = jax.random.uniform(
        kb, (out_channels,), jnp.float32, -bound, bound)
    return weight, bias


if __name__ == "__main__":
    key = jax.random.PRNGKey(0)
    k_x, k_p = jax.random.split(key)

    N, C_in, C_out, L = 2, 4, 8, 16
    x = jax.random.normal(k_x, (N, C_in, L), jnp.float32)
    weight, bias = init_params(k_p, C_in, C_out)

    out = out_conv(x, weight, bias)
    out = jax.block_until_ready(out)

    # Reference: Conv1d kernel_size=1 == channel matmul + bias.
    ref = jnp.einsum("oc,ncl->nol", weight, x) + bias[None, :, None]
    assert out.shape == (N, C_out, L)
    assert jnp.allclose(out, ref, atol=1e-5, rtol=1e-5)

    print("KERNEL_OK")
</pallas_src>

<mosaic_0001>
module attributes {stable_mosaic.version = 11 : i64} {
  func.func @outconv_kernel(%arg0: i32, %arg1: i32, %arg2: memref<1x4x128xf32, #tpu.memory_space<vmem>>, %arg3: memref<8x4xf32, #tpu.memory_space<vmem>>, %arg4: memref<8x1xf32, #tpu.memory_space<vmem>>, %arg5: memref<1x8x128xf32, #tpu.memory_space<vmem>>) attributes {dimension_semantics = [#tpu.dimension_semantics<parallel>, #tpu.dimension_semantics<parallel>], iteration_bounds = array<i64: 2, 1>, scalar_prefetch = 0 : i64, scratch_operands = 0 : i64, tpu.core_type = #tpu.core_type<tc>, window_params = [{transform_indices = @transform_0, window_bounds = array<i64: 1, 4, 128>}, {pipeline_mode = #tpu.pipeline_mode<synchronous>, transform_indices = @transform_1, window_bounds = array<i64: 8, 4>}, {pipeline_mode = #tpu.pipeline_mode<synchronous>, transform_indices = @transform_2, window_bounds = array<i64: 8, 1>}, {transform_indices = @transform_3, window_bounds = array<i64: 1, 8, 128>}]} {
    %c0 = arith.constant 0 : index
    %c0_0 = arith.constant 0 : index
    %0 = vector.load %arg3[%c0, %c0_0] : memref<8x4xf32, #tpu.memory_space<vmem>>, vector<8x4xf32>
    %c0_1 = arith.constant 0 : index
    %c0_2 = arith.constant 0 : index
    %c0_3 = arith.constant 0 : index
    %1 = vector.load %arg2[%c0_1, %c0_2, %c0_3] : memref<1x4x128xf32, #tpu.memory_space<vmem>>, vector<1x4x128xf32>
    %2 = vector.shape_cast %1 : vector<1x4x128xf32> to vector<4x128xf32>
    %cst = arith.constant dense<0.000000e+00> : vector<8x128xf32>
    %3 = tpu.matmul %0, %2, %cst {dimension_numbers = #tpu.dot_dimension_numbers<[1], [0], [0], [1], [0, 0, 1, 1], [], []>} : vector<8x4xf32>, vector<4x128xf32>, vector<8x128xf32> -> vector<8x128xf32>
    %c0_4 = arith.constant 0 : index
    %c0_5 = arith.constant 0 : index
    %4 = vector.load %arg4[%c0_4, %c0_5] : memref<8x1xf32, #tpu.memory_space<vmem>>, vector<8x1xf32>
    %5 = vector.broadcast %4 : vector<8x1xf32> to vector<8x128xf32>
    %6 = arith.addf %3, %5 : vector<8x128xf32>
    %c0_6 = arith.constant 0 : index
    %c0_7 = arith.constant 0 : index
    %c0_8 = arith.constant 0 : index
    %7 = vector.load %arg5[%c0_6, %c0_7, %c0_8] : memref<1x8x128xf32, #tpu.memory_space<vmem>>, vector<1x8x128xf32>
    %8 = vector.shape_cast %7 : vector<1x8x128xf32> to vector<8x128xf32>
    %9 = vector.shape_cast %6 : vector<8x128xf32> to vector<1x8x128xf32>
    tpu.vector_store %arg5[%c0_6, %c0_7, %c0_8], %9 {strides = array<i32>} : memref<1x8x128xf32, #tpu.memory_space<vmem>>, vector<1x8x128xf32>,
    return
  }
  func.func @transform_0(%arg0: i32, %arg1: i32) -> (i32, i32, i32) {
    %c0_i32 = arith.constant 0 : i32
    %c0_i32_0 = arith.constant 0 : i32
    return %arg0, %c0_i32, %arg1 : i32, i32, i32
  }
  func.func @transform_1(%arg0: i32, %arg1: i32) -> (i32, i32) {
    %c0_i32 = arith.constant 0 : i32
    %c0_i32_0 = arith.constant 0 : i32
    %c0_i32_1 = arith.constant 0 : i32
    return %c0_i32, %c0_i32_0 : i32, i32
  }
  func.func @transform_2(%arg0: i32, %arg1: i32) -> (i32, i32) {
    %c0_i32 = arith.constant 0 : i32
    %c0_i32_0 = arith.constant 0 : i32
    %c0_i32_1 = arith.constant 0 : i32
    return %c0_i32, %c0_i32_0 : i32, i32
  }
  func.func @transform_3(%arg0: i32, %arg1: i32) -> (i32, i32, i32) {
    %c0_i32 = arith.constant 0 : i32
    %c0_i32_0 = arith.constant 0 : i32
    return %arg0, %c0_i32, %arg1 : i32, i32, i32
  }
}

</mosaic_0001>

<bundles_post_ra>
// kernel: tpu_custom_call.1
= control target key start
LH: loop header
LB: loop body
LE: loop exit
PB: predicated region body
PF: predicated region fallthrough
CT: control target
= control target key end

     0   :  { %8 = vsyncpa [#allocation3], 0  ;;  %s665_s0 = inlined_call_operand.vmem [shape: f32[2,4,128], index: 0, kind: input, shape index: {}]   ;;  %s666_s1 = inlined_call_operand.vmem [shape: f32[8,4], index: 1, kind: input, shape index: {}]   ;;  %s667_s2 = inlined_call_operand.vmem [shape: f32[8,1], index: 2, kind: input, shape index: {}]   ;;  %s668_s3 = inlined_call_operand.hbm [shape: f32[2,8,128], index: 3, kind: output, shape index: {}]  }
   0x1   :  { %10 = vsyncpa [#allocation3 + $0x1], 0  ;;  %s547_s12 = smov 0   ;;  %s549_s13 = smov 0  }
   0x2   :  { %s551_s14 = smov 0   ;;  %s553_s15 = smov 0  }
   0x3   :  { %s555_s16 = smov 0   ;;  %s557_s17 = smov 0  }
   0x4 LB: > { %s364_s18 = sadd.s32 4294967295, %s521_s17   ;;  %s365_s19 = sadd.s32 4294967294, %s521_s17   ;;  %s521_s17 = sphi %s557_s17, %s16_s17   ;;  %s517_s16 = sphi %s555_s16, %s675_s16   ;;  %s513_s15 = sphi %s553_s15, %s674_s15   ;;  %s509_s14 = sphi %s551_s14, %s673_s14   ;;  %s505_s13 = sphi %s549_s13, %s672_s13   ;;  %s501_s12 = sphi %s547_s12, %s671_s12  }
   0x5   : > { %s28_s20 = sadd.s32 1, %s517_s16  ;;  %s107_s21 = sadd.s32 1, %s509_s14 }
   0x6   : > { %p30_p0 = scmp.ge.s32.totalorder %s28_s20, 2  ;;  %p117_p1 = scmp.ne.s32.totalorder %s509_s14, %s505_s13 }
   0x7   : > { %p118_p2 = scmp.eq.s32.totalorder %s364_s18, 1  ;;  %p123_p3 = scmp.ne.s32.totalorder %s505_s13, %s501_s12 }
   0x8   : > { %s677_s20 = smov (%p30_p0, %s28_s20), 0  ;;  %p124_p5 = scmp.eq.s32.totalorder %s365_s19, 1 }
   0x9   : > { %p587_p4 = por %p118_p2, %p117_p1  ;;  %s102_s23 = ssub.s32 %s517_s16, %s677_s20 }
   0xa   : > { %p368_p6 = scmp.ge.s32.totalorder %s521_s17, 1  ;;  %p105_p7 = scmp.eq.s32.totalorder %s102_s23, 0 }
   0xb   : > { %p594_p8 = por %p124_p5, %p123_p3  ;;  %p158_p9 = scmp.lt.s32.totalorder %s521_s17, 3 }
   0xc   : > { %s600_s25 = scalar_select %p105_p7, %s509_s14, %s107_s21  }
   0xd   : > { %p159_p10 = pnand %p368_p6, %p158_p9 }
   0xe   : > { %p184_p11 = scmp.lt.s32.totalorder (!%p159_p10), %s513_s15, 1  ;;  %v523_v0 = vmov (!%p159_p10), 0.0   ;;  %vm524_vm0 = vmmov (!%p159_p10), 0   ;;  %v193_v1 = vld [vmem:[%s667_s2] sm:$0xff] (!%p159_p10)  ;;  %v525_v2 = vmov (!%p159_p10), 0   ;;  %vm203_vm1 = vcmask (!%p159_p10), 1043456  }
   0xf   : > { %162 = sbr.rel (%p159_p10) target bundleno = 256 (0x100), region = 32  ;;  %379 = vmatprep.subr.mxu0 (!%p159_p10), %v523_v0  ;;  %381 = vmatprep.mubr.msk.f32.mxu0 (!%p159_p10), %vm524_vm0, %v523_v0  ;;  %v191_v3 = vld [vmem:[%s666_s1] sm:$0xff] (!%p159_p10)  ;;  %vm199_vm2 = vcmask (!%p159_p10), 31744   ;;  %s181_s8 = sand.u32 (!%p159_p10), 1, %s505_s13  }
  0x10   : > { %442 = vset.pattern.permute.xlu0 (!%p159_p10), %v525_v2  ;;  %s369_s9 = sshll.u32 (!%p159_p10), %s181_s8, 3  ;;  %s374_s10 = sshll.u32 (!%p159_p10), %s513_s15, 7 }
  0x11   : > { %196 = vperm.xlu0 (!%p159_p10), %442, %v193_v1   ;;  %s183_s11 = scalar_lea.vmem (!%p159_p10), [#allocation2], %s369_s9  ;;  %s618_s23 = scalar_lea.hbm (!%p159_p10), %s668_s3, %s374_s10 }
  0x12   : > { %s293_s18 = sshll.u32 (!%p159_p10), %s183_s11, 4  ;;  %s279_s26 = scalar_lea.sflag (!%p159_p10), [#allocation3], %s181_s8  ;;  %s620_s18 = int_to_ptr.vmem [resolvable:$true] %s293_s18 }
  0x13   : > { %s443_s27 = scalar_lea.vmem (!%p159_p10), %s620_s18, 128 }
  0x14   : > { %p444_p12 = scmp.ne.s32.totalorder (!%p159_p10), %s620_s18, %s443_s27 }
  0x16   : > { %s185_s28 = scalar_select %p184_p11, %s513_s15, 1 }
  0x17   : > { %p445_p13 = pnand %p444_p12, %p587_p4  ;;  %s526_s15 = smov [#allocation2]  }
  0x18   : > { %s370_s29 = sshll.u32 %s185_s28, 2  ;;  %s447_s28 = sshll.u32 %s526_s15, 4  ;;  %s448_s28 = int_to_ptr.vmem [resolvable:$false] %s447_s28 }
  0x19   : > { %s190_s5 = scalar_lea.vmem %s665_s0, %s370_s29  ;;  %p446_p0 = pneg %p445_p13 }
  0x1a   : > { %v192_v4 = vld [vmem:[%s190_s5] sm:$0xf]  ;;  %s449_s29 = scalar_lea.vmem %s448_s28, 256  ;;  %p450_p1 = scmp.lt.s32.totalorder %s620_s18, %s448_s28 }
  0x1b   : > { %380 = vmatpush3.msk.msra.mxu0 %vm203_vm1, %v192_v4  ;;  %p451_p2 = scmp.lt.s32.totalorder %s449_s29, %s443_s27 }
  0x1c   : > { %382 = vmatmul.mubr.msk.f32.vlgmr.msra.gmra.mrb[0].mxu0 %vm199_vm2, %v191_v3 }
  0x1d   : > { %p452_p3 = por %p451_p2, %p450_p1 }
  0x1f   : > { %p453_p5 = pnand %p452_p3, %p446_p0 }
  0x90   : > { %v197_v5 = vpop.permute.xlu0 %196 }
  0xef   : > { %v273_v6 = vpop.f32.mrb[0].mxu0 }
  0xf0   : > { %v274_v7 = vadd.f32 %v273_v6, %v197_v5  ;;  %v383_v8 = vpop.f32.mrb[1].mxu0 }
  0xf2   : > { %277 = vst [vmem:[%s183_s11] sm:$0xff] %v274_v7 }
  0xf3   : > { %456 = shalt.err (!%p453_p5)
}
  0xf4   : > { %s457_s30 = scalar_lea.hbm %s618_s23, 128  ;;  %s461_s6 = scalar_lea.hbm %s668_s3, 256 }
  0xf5   : > { %p458_p6 = scmp.ne.s32.totalorder %s618_s23, %s457_s30  ;;  %p462_p10 = scmp.lt.u32.totalorder %s618_s23, %s668_s3 }
  0xf6   : > { %p463_p11 = scmp.lt.u32.totalorder %s461_s6, %s457_s30  ;;  %p465_p13 = scmp.lt.u32.totalorder %s457_s30, %s618_s23 }
  0xf7   : > { %p459_p7 = pnand %p458_p6, %p587_p4 }
  0xf8   : > { %p464_p12 = por %p463_p11, %p462_p10 }
  0xf9   : > { %p460_p9 = pneg %p459_p7 }
  0xfa   : > { %p466_p0 = por %p465_p13, %p464_p12 }
  0xfc   : > { %p467_p1 = pnand %p466_p0, %p460_p9 }
  0xfe   : > { %470 = shalt.err (!%p467_p1)
}
  0xff   : > { %384 = dma.vmem_to_hbm [thread:$0]  (%p587_p4), %s620_s18, 128, %s618_s23, %s279_s26  }
 0x100 PF: > { %p390_p2 = scmp.ge.s32.totalorder %s521_s17, 2  ;;  %s305_s9 = sand.u32 1, %s501_s12  }
 0x101   : > { %s306_s10 = scalar_lea.sflag [#allocation3], %s305_s9 }
 0x102   : > { %p387_p3 = pnand %p390_p2, %p594_p8 }
 0x104   : > { %496 = dma.done.wait (!%p387_p3), %s306_s10, 128  }
 0x105   : > { %498 = vsyncadd (!%p387_p3), %s306_s10, 4294967168  ;;  %s16_s17 = sadd.s32 1, %s521_s17   ;;  %s671_s12 = smov %s505_s13 }
 0x106   : > { %p13_p5 = scmp.ge.s32.totalorder %s16_s17, 4   ;;  %s672_s13 = smov %s509_s14 }
 0x107   : > { %s673_s14 = smov %s600_s25  ;;  %s674_s15 = smov %s517_s16 }
 0x108   : > { %s675_s16 = smov %s677_s20  ;;  %15 = sbr.rel (!%p13_p5) target bundleno = 4 (0x4), region = 67 }
 0x10f   :  { %311 = vsyncpa [#allocation3], 1 }
 0x110   :  { %313 = vsyncpa [#allocation3 + $0x1], 1 }

</bundles_post_ra>
